<compile_context>
chip_gen: v6e
topology: v6e:2x2x1
jax: 0.10.0
libtpu: 0.0.40
codegen_flags: <defaults>
</compile_context>

<pallas_src>
import numpy as np
import jax
import jax.numpy as jnp
from jax.experimental import pallas as pl
from jax.experimental.pallas import tpu as pltpu

BN_EPS = 1e-5   # nn.BatchNorm2d default eps
KSIZE = 7       # SpatialGate kernel_size


# --------------------------------------------------------------------------- kernel
def _spatial_gate_kernel(x_ref, k_ref, b_ref, o_ref):
    """One batch TILE per grid step.

    x_ref : (TB, C, HW) f32   input block, pixels (HW) lane-dense
    k_ref : (2*HW, HW)  bf16  dense conv operator (BN scale folded in)
    b_ref : (1,)        f32   folded BN bias (SMEM scalar)
    o_ref : (TB, C, HW) f32   gated output block
    """
    x = x_ref[...]                                          # (TB, C, HW)

    # ChannelPool: max / mean over the channel axis (XLU sublane reduce).
    mx = jnp.max(x, axis=1)                                 # (TB, HW)
    mn = jnp.mean(x, axis=1)                                # (TB, HW)
    pooled = jnp.concatenate([mx, mn], axis=1)              # (TB, 2*HW)

    # 7x7 conv (2 -> 1, pad 3) + folded BN scale as ONE batched MXU matmul.
    conv = jnp.dot(pooled.astype(jnp.bfloat16), k_ref[...],
                   preferred_element_type=jnp.float32)      # (TB, HW) f32

    scale = jax.nn.sigmoid(conv + b_ref[0])                 # (TB, HW) f32
    o_ref[...] = x * scale[:, None, :]                      # broadcast over C


# ------------------------------------------------------------------------- wrapper
def _pick_batch_tile(B, C, HW, vmem_budget=12 * 1024 * 1024):
    """Batch-tile size: fill MXU rows, respect VMEM, keep >=2 grid steps (v7x)."""
    k_bytes = 2 * (2 * HW) * HW * 2          # bf16 operator, double-buffered
    per_b = 2 * 2 * C * HW * 4               # f32 x + out blocks, double-buffered
    cap = max(1, (vmem_budget - k_bytes) // per_b)
    tb = min(128, B, cap)                    # 128 = one v5e MXU M-pass
    if B >= 2:                               # leave work for both v7x TensorCores
        tb = min(tb, (B + 1) // 2)
    return max(1, int(tb))


def spatial_gate_forward(x_nchw, params, *, tb=None):
    """x_nchw: (B, C, H, W) float32 -> (B, C, H, W) float32."""
    B, C, H, W = x_nchw.shape
    HW = H * W
    if tb is None:
        tb = _pick_batch_tile(B, C, HW)
    grid_b = pl.cdiv(B, tb)
    Bp = grid_b * tb

    xf = x_nchw.reshape(B, C, HW).astype(jnp.float32)       # pure reshape
    if Bp != B:                                             # pad batch to tile mult
        xf = jnp.pad(xf, ((0, Bp - B), (0, 0), (0, 0)))

    kbig = params['kbig']                                   # (2*HW, HW) bf16
    bias = params['bias']                                   # (1,) f32

    out = pl.pallas_call(
        _spatial_gate_kernel,
        out_shape=jax.ShapeDtypeStruct((Bp, C, HW), jnp.float32),
        grid=(grid_b,),
        in_specs=[
            pl.BlockSpec((tb, C, HW), lambda b: (b, 0, 0)),
            pl.BlockSpec((2 * HW, HW), lambda b: (0, 0)),        # constant operator
            pl.BlockSpec(memory_space=pltpu.MemorySpace.SMEM),   # scalar bias
        ],
        out_specs=pl.BlockSpec((tb, C, HW), lambda b: (b, 0, 0)),
        compiler_params=pltpu.CompilerParams(
            dimension_semantics=("parallel",),              # batch tiles across TCs
            vmem_limit_bytes=32 * 1024 * 1024),
    )(xf, kbig, bias)

    if Bp != B:
        out = out[:B]
    return out.reshape(B, C, H, W)


# ------------------------------------------------------------ host-side weight prep
def build_conv_operator(w7, H, W):
    """w7: (2, kh, kw) conv weight (out-channel 0; in-chan 0 = max, 1 = mean).

    Returns a dense (2*H*W, H*W) operator M with zero padding baked in so that
      conv_flat[p_out] = sum_q pooled_flat[q] * M[q, p_out]
    matches a stride-1, pad-(k-1)/2 cross-correlation (PyTorch Conv2d semantics).
    """
    w7 = np.asarray(w7, np.float32)
    kh, kw = w7.shape[1], w7.shape[2]
    ph, pw = (kh - 1) // 2, (kw - 1) // 2
    K = np.zeros((2, H, W, H, W), np.float32)   # [cin, h_in, w_in, h_out, w_out]
    ho = np.arange(H)
    wo = np.arange(W)
    for dy in range(kh):
        hi = ho + dy - ph
        vh = (hi >= 0) & (hi < H)
        hiv, hov = hi[vh], ho[vh]
        for dx in range(kw):
            wi = wo + dx - pw
            vw = (wi >= 0) & (wi < W)
            wiv, wov = wi[vw], wo[vw]
            for cin in range(2):
                K[cin, hiv[:, None], wiv[None, :],
                  hov[:, None], wov[None, :]] = w7[cin, dy, dx]
    return K.reshape(2 * H * W, H * W)


def prepare_params(raw, H, W):
    """Fold eval-mode BN into the dense conv operator (bf16) + scalar bias."""
    s = raw['gamma'] / jnp.sqrt(raw['var'] + BN_EPS)          # BN scale (scalar)
    b = raw['beta'] - s * raw['mean']                         # BN bias  (scalar)
    kop = build_conv_operator(np.asarray(raw['w7'])[0], H, W)
    return {
        'kbig': (jnp.asarray(kop, jnp.float32) * s).astype(jnp.bfloat16),  # (2HW,HW)
        'bias': jnp.reshape(b, (1,)).astype(jnp.float32),                  # (1,)
    }


def init_raw_params(key):
    """Deterministic synthetic parameters (fresh BN running stats: mean=0, var=1)."""
    kw_, kg, kb = jax.random.split(key, 3)
    return {
        'w7': 0.1 * jax.random.normal(kw_, (1, 2, KSIZE, KSIZE), jnp.float32),
        'gamma': 1.0 + 0.1 * jax.random.normal(kg, (), jnp.float32),
        'beta': 0.1 * jax.random.normal(kb, (), jnp.float32),
        'mean': jnp.zeros((), jnp.float32),
        'var': jnp.ones((), jnp.float32),
    }


# ----------------------------------------------------------------- pure-JAX reference
def spatial_gate_reference(x, raw):
    """Faithful pure-JAX reference of SpatialGate.forward (eval-mode BN)."""
    xm = jnp.max(x, axis=1, keepdims=True)
    xa = jnp.mean(x, axis=1, keepdims=True)
    xc = jnp.concatenate([xm, xa], axis=1)                    # (B, 2, H, W)
    pad = (KSIZE - 1) // 2
    y = jax.lax.conv_general_dilated(
        xc, raw['w7'], window_strides=(1, 1),
        padding=[(pad, pad), (pad, pad)],
        dimension_numbers=('NCHW', 'OIHW', 'NCHW'))           # (B, 1, H, W)
    s = raw['gamma'] / jnp.sqrt(raw['var'] + BN_EPS)
    y = (y - raw['mean']) * s + raw['beta']
    return x * jax.nn.sigmoid(y)


# --------------------------------------------------------------------------- main
if __name__ == "__main__":
    B, C, H, W = 2, 4, 16, 16
    key = jax.random.PRNGKey(0)
    kx, kp = jax.random.split(key)
    x = jax.random.normal(kx, (B, C, H, W), jnp.float32)

    raw = init_raw_params(kp)
    params = prepare_params(raw, H, W)

    out = spatial_gate_forward(x, params)
    out = jax.block_until_ready(out)
    assert out.shape == (B, C, H, W)

    ref = spatial_gate_reference(x, raw)
    np.testing.assert_allclose(np.asarray(out), np.asarray(ref),
                               rtol=2e-2, atol=2e-2)
    print("KERNEL_OK")
</pallas_src>

<mosaic_0001>
module attributes {stable_mosaic.version = 11 : i64} {
  func.func @_spatial_gate_kernel(%arg0: i32, %arg1: memref<1x4x256xf32, #tpu.memory_space<vmem>>, %arg2: memref<512x256xbf16, #tpu.memory_space<vmem>>, %arg3: memref<1xf32, #tpu.memory_space<smem>>, %arg4: memref<1x4x256xf32, #tpu.memory_space<vmem>>) attributes {dimension_semantics = [#tpu.dimension_semantics<parallel>], iteration_bounds = array<i64: 2>, scalar_prefetch = 0 : i64, scratch_operands = 0 : i64, tpu.core_type = #tpu.core_type<tc>, window_params = [{transform_indices = @transform_0, window_bounds = array<i64: 1, 4, 256>}, {pipeline_mode = #tpu.pipeline_mode<synchronous>, transform_indices = @transform_1, window_bounds = array<i64: 512, 256>}, {transform_indices = @transform_2, window_bounds = array<i64: 1>}, {transform_indices = @transform_3, window_bounds = array<i64: 1, 4, 256>}]} {
    %c0 = arith.constant 0 : index
    %c0_0 = arith.constant 0 : index
    %c0_1 = arith.constant 0 : index
    %0 = vector.load %arg1[%c0, %c0_0, %c0_1] : memref<1x4x256xf32, #tpu.memory_space<vmem>>, vector<1x4x256xf32>
    %cst = arith.constant dense<0xFF800000> : vector<1x256xf32>
    %1 = vector.multi_reduction <maximumf>, %0, %cst [1] : vector<1x4x256xf32> to vector<1x256xf32>
    %cst_2 = arith.constant dense<0.000000e+00> : vector<1x256xf32>
    %2 = vector.multi_reduction <add>, %0, %cst_2 [1] : vector<1x4x256xf32> to vector<1x256xf32>
    %cst_3 = arith.constant 4.000000e+00 : f32
    %3 = vector.broadcast %cst_3 : f32 to vector<1x256xf32>
    %4 = arith.divf %2, %3 : vector<1x256xf32>
    %5 = tpu.concatenate %1, %4 in 1 : vector<1x256xf32>, vector<1x256xf32> -> vector<1x512xf32>
    %6 = arith.truncf %5 : vector<1x512xf32> to vector<1x512xbf16>
    %c0_4 = arith.constant 0 : index
    %c0_5 = arith.constant 0 : index
    %7 = vector.load %arg2[%c0_4, %c0_5] : memref<512x256xbf16, #tpu.memory_space<vmem>>, vector<512x256xbf16>
    %cst_6 = arith.constant dense<0.000000e+00> : vector<1x256xf32>
    %8 = tpu.matmul %6, %7, %cst_6 {dimension_numbers = #tpu.dot_dimension_numbers<[1], [0], [0], [1], [0, 0, 1, 1], [], []>} : vector<1x512xbf16>, vector<512x256xbf16>, vector<1x256xf32> -> vector<1x256xf32>
    %c0_7 = arith.constant 0 : index
    %9 = memref.load %arg3[%c0_7] : memref<1xf32, #tpu.memory_space<smem>>
    %10 = vector.broadcast %9 : f32 to vector<1x256xf32>
    %11 = arith.addf %8, %10 : vector<1x256xf32>
    %12 = arith.negf %11 : vector<1x256xf32>
    %13 = math.exp %12 : vector<1x256xf32>
    %cst_8 = arith.constant 1.000000e+00 : f32
    %14 = vector.broadcast %cst_8 : f32 to vector<1x256xf32>
    %15 = arith.addf %14, %13 : vector<1x256xf32>
    %16 = arith.divf %14, %15 : vector<1x256xf32>
    %17 = vector.shape_cast %16 : vector<1x256xf32> to vector<1x1x256xf32>
    %18 = vector.broadcast %17 : vector<1x1x256xf32> to vector<1x4x256xf32>
    %19 = arith.mulf %0, %18 : vector<1x4x256xf32>
    %c0_9 = arith.constant 0 : index
    %c0_10 = arith.constant 0 : index
    %c0_11 = arith.constant 0 : index
    %20 = vector.load %arg4[%c0_9, %c0_10, %c0_11] : memref<1x4x256xf32, #tpu.memory_space<vmem>>, vector<1x4x256xf32>
    tpu.vector_store %arg4[%c0_9, %c0_10, %c0_11], %19 {strides = array<i32>} : memref<1x4x256xf32, #tpu.memory_space<vmem>>, vector<1x4x256xf32>,
    return
  }
  func.func @transform_0(%arg0: i32) -> (i32, i32, i32) {
    %c0_i32 = arith.constant 0 : i32
    %c0_i32_0 = arith.constant 0 : i32
    %c0_i32_1 = arith.constant 0 : i32
    return %arg0, %c0_i32, %c0_i32_0 : i32, i32, i32
  }
  func.func @transform_1(%arg0: i32) -> (i32, i32) {
    %c0_i32 = arith.constant 0 : i32
    %c0_i32_0 = arith.constant 0 : i32
    %c0_i32_1 = arith.constant 0 : i32
    return %c0_i32, %c0_i32_0 : i32, i32
  }
  func.func @transform_2(%arg0: i32) -> i32 {
    %c0_i32 = arith.constant 0 : i32
    %c0_i32_0 = arith.constant 0 : i32
    return %c0_i32 : i32
  }
  func.func @transform_3(%arg0: i32) -> (i32, i32, i32) {
    %c0_i32 = arith.constant 0 : i32
    %c0_i32_0 = arith.constant 0 : i32
    %c0_i32_1 = arith.constant 0 : i32
    return %arg0, %c0_i32, %c0_i32_0 : i32, i32, i32
  }
}

</mosaic_0001>

<bundles_post_ra>
// kernel: tpu_custom_call.1
= control target key start
LH: loop header
LB: loop body
LE: loop exit
PB: predicated region body
PF: predicated region fallthrough
CT: control target
= control target key end

     0   :  { %s1404_s0 = inlined_call_operand.hbm [shape: f32[2,4,256], index: 0, kind: input, shape index: {}]   ;;  %s1405_s1 = inlined_call_operand.hbm [shape: bf16[512,256], index: 1, kind: input, shape index: {}]   ;;  %s1406_s2 = inlined_call_operand.<no memory space> [shape: f32[1], index: 2, kind: input, shape index: {}]   ;;  %s1407_s3 = inlined_call_operand.hbm [shape: f32[2,4,256], index: 3, kind: output, shape index: {}]  }
   0x1   :  { %8 = sst [smem:[#allocation2]] %s1406_s2 }
   0x2   :  { %9 = vsyncpa [#allocation4], 0 }
   0x3   :  { %11 = vsyncpa [#allocation4 + $0x1], 0 }
   0x4   :  { %12 = vsyncpa [#allocation7], 0 }
   0x5   :  { %13 = vsyncpa [#allocation5], 0 }
   0x6   :  { %15 = vsyncpa [#allocation5 + $0x1], 0  ;;  %s1232_s14 = smov 0   ;;  %s1234_s15 = smov 0  }
   0x7   :  { %s1236_s16 = smov 0   ;;  %s1238_s17 = smov 0  }
   0x8 LB: > { %s1253_s2 = sadd.s32 4294967295, %s1202_s17   ;;  %s832_s18 = sadd.s32 4294967294, %s1202_s17   ;;  %s1202_s17 = sphi %s1238_s17, %s1429_s17   ;;  %s1198_s16 = sphi %s1236_s16, %s1428_s16   ;;  %s1194_s15 = sphi %s1234_s15, %s1427_s15   ;;  %s1190_s14 = sphi %s1232_s14, %s1426_s14  }
   0x9   : > { %p41_p0 = scmp.ne.s32.totalorder %s1194_s15, %s1190_s14  ;;  %p1408_p1 = scmp.eq.s32.totalorder %s1253_s2, 0 }
   0xa   : > { %p113_p3 = scmp.eq.s32.totalorder %s832_s18, 1  ;;  %p833_p5 = scmp.ge.s32.totalorder %s1202_s17, 1 }
   0xb   : > { %p1262_p4 = por %p1408_p1, %p41_p0  ;;  %p120_p7 = scmp.lt.s32.totalorder %s1202_s17, 3 }
   0xc   : > { %p1267_p6 = por %p113_p3, %p41_p0  ;;  %s1204_s22 = smov [#allocation6]  }
   0xd   : > { %s1412_s19 = scalar_select %p1262_p4, 1, 0 }
   0xe   : > { %s1413_s20 = scalar_select %p1267_p6, 1, 0 }
   0xf   : > { %p1272_p8 = pnand %p833_p5, %p120_p7  ;;  %s132_s23 = sshll.u32 %s1204_s22, 4  ;;  %s133_s23 = int_to_ptr.vmem [resolvable:$true] %s132_s23 }
  0x10   : > { %s1286_s25 = sadd.s32 1, %s1202_s17   ;;  %s28_s26 = sadd.s32 1, %s1198_s16 }
  0x11   : > { %s1414_s21 = scalar_select %p1272_p8, 1, 0 }
  0x12   : > { %p924_p9 = pneg %p1272_p8  ;;  %s25_s27 = ssub.s32 %s1202_s17, %s1286_s25 }
  0x13   : > { %s1091_s28 = scalar_lea.vmem %s133_s23, 8192  ;;  %p1099_p5 = scmp.lt.s32.totalorder %s133_s23, %s133_s23 }
  0x14   : > { %p1281_p11 = pnand %p924_p9, %p1408_p1  ;;  %p1092_p13 = scmp.ne.s32.totalorder %s133_s23, %s1091_s28 }
  0x15   : > { %p1100_p7 = scmp.lt.s32.totalorder %s1091_s28, %s1091_s28 }
  0x16   : > { %p1082_p12 = pneg %p1281_p11 }
  0x17   : > { %p1101_p10 = por %p1100_p7, %p1099_p5 }
  0x18   : > { %p1094_p0 = pnand %p1092_p13, %p1082_p12 }
  0x1a   : > { %p1095_p3 = pneg %p1094_p0 }
  0x1c   : > { %p1102_p2 = pnand %p1101_p10, %p1095_p3 }
  0x1e   : > { %1105 = shalt.err (!%p1102_p2)
}
  0x1f   : > { %s1205_s29 = smov 128   ;;  %s1206_s30 = smov 8  }
  0x20   : > { %927 = dma.hbm_to_vmem [thread:$0]  (!%p1281_p11), %s1405_s1, 8192, %s133_s23, [#allocation7], %s1205_s29, %s1205_s29, %s1206_s30  }
  0x21   : > { %p26_p9 = scmp.eq.s32.totalorder %s25_s27, 0  ;;  %p35_p12 = scmp.ne.s32.totalorder %s1198_s16, %s1194_s15 }
  0x22   : > { %p36_p10 = scmp.eq.s32.totalorder %s1202_s17, 0  ;;  %p937_p2 = scmp.lt.s32.totalorder %s1202_s17, 2 }
  0x23   : > { %s1303_s6 = scalar_select %p26_p9, %s1198_s16, %s28_s26  }
  0x24   : > { %p37_p13 = por %p36_p10, %p35_p12  ;;  %p1416_p0 = scmp.eq.s32.totalorder %s1253_s2, 1 }
  0x25   : > { %s149_s8 = sand.u32 1, %s1198_s16   ;;  %s914_s9 = sshll.u32 %s1202_s17, 7 }
  0x26   : > { %p1307_p3 = por %p1416_p0, %p35_p12  ;;  %s836_s10 = sshll.u32 %s149_s8, 3 }
  0x27   : > { %s1316_s13 = scalar_lea.hbm %s1404_s0, %s914_s9  ;;  %s153_s18 = scalar_lea.vmem [#allocation3], %s836_s10 }
  0x28   : > { %s1417_s7 = scalar_select %p1307_p3, 1, 0 }
  0x29   : > { %s161_s22 = sshll.u32 %s153_s18, 4  ;;  %p1318_p11 = pnand %p937_p2, %p37_p13  ;;  %s162_s22 = int_to_ptr.vmem [resolvable:$true] %s161_s22 }
  0x2a   : > { %s150_s24 = scalar_lea.sflag [#allocation4], %s149_s8  ;;  %s1106_s26 = scalar_lea.hbm %s1316_s13, 128 }
  0x2b   : > { %p1107_p5 = scmp.ne.s32.totalorder %s1316_s13, %s1106_s26  ;;  %p1108_p7 = pneg %p1318_p11 }
  0x2c   : > { %s1111_s29 = scalar_lea.hbm %s1404_s0, 256  ;;  %p1112_p10 = scmp.lt.s32.totalorder %s1316_s13, %s1404_s0 }
  0x2d   : > { %p1109_p9 = pnand %p1108_p7, %p1107_p5  ;;  %p1113_p2 = scmp.lt.s32.totalorder %s1111_s29, %s1106_s26 }
  0x2f   : > { %p1110_p12 = pneg %p1109_p9  ;;  %p1114_p13 = por %p1113_p2, %p1112_p10 }
  0x31   : > { %p1115_p0 = pnand %p1114_p13, %p1110_p12 }
  0x33   : > { %1118 = shalt.err (!%p1115_p0)
}
  0x34   : > { %s1119_s5 = scalar_lea.vmem %s162_s22, 128  ;;  %s1207_s8 = smov [#allocation3]  }
  0x35   : > { %p1120_p1 = scmp.ne.s32.totalorder %s162_s22, %s1119_s5  ;;  %s1124_s9 = sshll.u32 %s1207_s8, 4  ;;  %s1125_s9 = int_to_ptr.vmem [resolvable:$false] %s1124_s9 }
  0x36   : > { %s1126_s10 = scalar_lea.vmem %s1125_s9, 256  ;;  %p1127_p5 = scmp.lt.s32.totalorder %s162_s22, %s1125_s9 }
  0x37   : > { %p1122_p6 = pnand %p1120_p1, %p1108_p7  ;;  %p1128_p9 = scmp.lt.s32.totalorder %s1126_s10, %s1119_s5 }
  0x39   : > { %p1123_p3 = pneg %p1122_p6  ;;  %p1129_p4 = por %p1128_p9, %p1127_p5 }
  0x3b   : > { %p1130_p8 = pnand %p1129_p4, %p1123_p3 }
  0x3d   : > { %1133 = shalt.err (!%p1130_p8)
}
  0x3e   : > { %931 = dma.hbm_to_vmem [thread:$0]  (!%p1318_p11), %s1316_s13, 128, %s162_s22, %s150_s24  }
  0x3f   : > { %p1419_p12 = scmp.ne.s32.totalorder %s1414_s21, 0 }
  0x40   : > { %s1339_s11 = sand.u32 (!%p1419_p12), 1, %s1194_s15   ;;  %p1420_p1 = scmp.ne.s32.totalorder (!%p1419_p12), %s1412_s19, 0 }
  0x41   : > { %170 = sbr.rel (%p1419_p12) target bundleno = 389 (0x185), region = 32  ;;  %s840_s12 = sshll.u32 (!%p1419_p12), %s1339_s11, 3 }
  0x42   : > { %s173_s18 = scalar_lea.sflag (!%p1419_p12), [#allocation4], %s1339_s11  ;;  %s1345_s26 = scalar_lea.vmem (!%p1419_p12), [#allocation3], %s840_s12 }
  0x46   : > { %1177 = dma.done.wait (%p1420_p1), %s173_s18, 128  }
  0x47   : > { %1179 = vsyncadd (%p1420_p1), %s173_s18, 4294967168  ;;  %p1421_p4 = scmp.eq.s32.totalorder %s1253_s2, 0 }
  0x49   : > { %1181 = dma.done.wait (%p1421_p4), [#allocation7], 8192   ;;  %p1422_p6 = pmov %p1421_p4 }
  0x4a   : > { %v975_v0 = vld [vmem:[#allocation6 + $0x74] ss:$8 sps:$4 sm:$0xff]   ;;  %v979_v2 = vld [vmem:[#allocation6 + $0x70] ss:$8 sps:$4 sm:$0xff]   ;;  %v981_v4 = vld [vmem:[#allocation6 + $0x64] ss:$8 sps:$4 sm:$0xff]  }
  0x4b   : > { %1183 = vsyncadd (%p1422_p6), [#allocation7], 4294959104  ;;  %v977_v1 = vld [vmem:[#allocation6 + $0x174] ss:$8 sps:$4 sm:$0xff]   ;;  %629 = vmatprep.subr.bf16.mxu0 %v975_v0  ;;  %v980_v3 = vld [vmem:[#allocation6 + $0x170] ss:$8 sps:$4 sm:$0xff]  }
  0x4c   : > { %670 = vmatprep.subr.bf16.mxu1 %v977_v1  ;;  %630 = vmatpush1.bf16.msra.mxu0 %v979_v2  ;;  %v983_v5 = vld [vmem:[#allocation6 + $0x164] ss:$8 sps:$4 sm:$0xff]   ;;  %v985_v6 = vld [vmem:[#allocation6 + $0x60] ss:$8 sps:$4 sm:$0xff]   ;;  %v987_v8 = vld [vmem:[#allocation6 + $0x54] ss:$8 sps:$4 sm:$0xff]  }
  0x4d   : > { %671 = vmatpush1.bf16.msra.mxu1 %v980_v3  ;;  %631 = vmatprep.subr.bf16.mxu0 %v981_v4  ;;  %v986_v7 = vld [vmem:[#allocation6 + $0x160] ss:$8 sps:$4 sm:$0xff]   ;;  %v989_v9 = vld [vmem:[#allocation6 + $0x154] ss:$8 sps:$4 sm:$0xff]   ;;  %v991_v10 = vld [vmem:[#allocation6 + $0x50] ss:$8 sps:$4 sm:$0xff]  }
  0x4e   : > { %672 = vmatprep.subr.bf16.mxu1 %v983_v5  ;;  %v992_v11 = vld [vmem:[#allocation6 + $0x150] ss:$8 sps:$4 sm:$0xff]   ;;  %v993_v12 = vld [vmem:[#allocation6 + $0x44] ss:$8 sps:$4 sm:$0xff]   ;;  %v997_v14 = vld [vmem:[#allocation6 + $0x40] ss:$8 sps:$4 sm:$0xff]  }
  0x4f   : > { %v995_v13 = vld [vmem:[#allocation6 + $0x144] ss:$8 sps:$4 sm:$0xff]   ;;  %v998_v15 = vld [vmem:[#allocation6 + $0x140] ss:$8 sps:$4 sm:$0xff]   ;;  %v999_v16 = vld [vmem:[#allocation6 + $0x34] ss:$8 sps:$4 sm:$0xff]  }
  0x50   : > { %632 = vmatpush1.bf16.msra.mxu0 %v985_v6  ;;  %v1001_v17 = vld [vmem:[#allocation6 + $0x134] ss:$8 sps:$4 sm:$0xff]   ;;  %v1003_v18 = vld [vmem:[#allocation6 + $0x30] ss:$8 sps:$4 sm:$0xff]   ;;  %v1005_v20 = vld [vmem:[#allocation6 + $0x24] ss:$8 sps:$4 sm:$0xff]  }
  0x51   : > { %673 = vmatpush1.bf16.msra.mxu1 %v986_v7  ;;  %633 = vmatprep.subr.bf16.mxu0 %v987_v8  ;;  %v1004_v19 = vld [vmem:[#allocation6 + $0x130] ss:$8 sps:$4 sm:$0xff]   ;;  %v1007_v21 = vld [vmem:[#allocation6 + $0x124] ss:$8 sps:$4 sm:$0xff]   ;;  %v1009_v22 = vld [vmem:[#allocation6 + $0x20] ss:$8 sps:$4 sm:$0xff]  }
  0x52   : > { %674 = vmatprep.subr.bf16.mxu1 %v989_v9  ;;  %v1010_v23 = vld [vmem:[#allocation6 + $0x120] ss:$8 sps:$4 sm:$0xff]   ;;  %v1011_v24 = vld [vmem:[#allocation6 + $0x14] ss:$8 sps:$4 sm:$0xff]   ;;  %v1015_v26 = vld [vmem:[#allocation6 + $0x10] ss:$8 sps:$4 sm:$0xff]  }
  0x53   : > { %v1013_v25 = vld [vmem:[#allocation6 + $0x114] ss:$8 sps:$4 sm:$0xff]   ;;  %v1016_v27 = vld [vmem:[#allocation6 + $0x110] ss:$8 sps:$4 sm:$0xff]   ;;  %v1017_v28 = vld [vmem:[#allocation6 + $0x4] ss:$8 sps:$4 sm:$0xff]  }
  0x54   : > { %634 = vmatpush1.bf16.msra.mxu0 %v991_v10  ;;  %v1019_v29 = vld [vmem:[#allocation6 + $0x104] ss:$8 sps:$4 sm:$0xff]   ;;  %v1021_v30 = vld [vmem:[#allocation6] ss:$8 sps:$4 sm:$0xff]   ;;  %v1023_v32 = vld [vmem:[#allocation6 + $0xf4] ss:$8 sps:$4 sm:$0xff]  }
  0x55   : > { %675 = vmatpush1.bf16.msra.mxu1 %v992_v11  ;;  %635 = vmatprep.subr.bf16.mxu0 %v993_v12  ;;  %v1022_v31 = vld [vmem:[#allocation6 + $0x100] ss:$8 sps:$4 sm:$0xff]   ;;  %v1025_v33 = vld [vmem:[#allocation6 + $0x1f4] ss:$8 sps:$4 sm:$0xff]   ;;  %v1027_v34 = vld [vmem:[#allocation6 + $0xf0] ss:$8 sps:$4 sm:$0xff]  }
  0x56   : > { %676 = vmatprep.subr.bf16.mxu1 %v995_v13  ;;  %v1028_v35 = vld [vmem:[#allocation6 + $0x1f0] ss:$8 sps:$4 sm:$0xff]   ;;  %v1029_v36 = vld [vmem:[#allocation6 + $0xe4] ss:$8 sps:$4 sm:$0xff]   ;;  %v1033_v38 = vld [vmem:[#allocation6 + $0xe0] ss:$8 sps:$4 sm:$0xff]  }
  0x57   : > { %v1031_v37 = vld [vmem:[#allocation6 + $0x1e4] ss:$8 sps:$4 sm:$0xff]   ;;  %v1034_v39 = vld [vmem:[#allocation6 + $0x1e0] ss:$8 sps:$4 sm:$0xff]   ;;  %v1035_v40 = vld [vmem:[#allocation6 + $0xd4] ss:$8 sps:$4 sm:$0xff]  }
  0x58   : > { %636 = vmatpush1.bf16.msra.mxu0 %v997_v14  ;;  %v1037_v41 = vld [vmem:[#allocation6 + $0x1d4] ss:$8 sps:$4 sm:$0xff]   ;;  %v1039_v42 = vld [vmem:[#allocation6 + $0xd0] ss:$8 sps:$4 sm:$0xff]   ;;  %v1041_v44 = vld [vmem:[#allocation6 + $0xc4] ss:$8 sps:$4 sm:$0xff]  }
  0x59   : > { %677 = vmatpush1.bf16.msra.mxu1 %v998_v15  ;;  %637 = vmatprep.subr.bf16.mxu0 %v999_v16  ;;  %v1040_v43 = vld [vmem:[#allocation6 + $0x1d0] ss:$8 sps:$4 sm:$0xff]   ;;  %vm207_vm0 = vcmask 1043456   ;;  %v1043_v45 = vld [vmem:[#allocation6 + $0x1c4] ss:$8 sps:$4 sm:$0xff]   ;;  %s307_s19 = sld [smem:[#allocation2]] }
  0x5a   : > { %678 = vmatprep.subr.bf16.mxu1 %v1001_v17  ;;  %v1356_v46 = vld [vmem:[%s1345_s26] sm:$0xff]  ;;  %v1045_v50 = vld [vmem:[#allocation6 + $0xc0] ss:$8 sps:$4 sm:$0xff]   ;;  %v1053_v4 = vld [vmem:[#allocation6 + $0xa4] ss:$8 sps:$4 sm:$0xff]   ;;  %s915_s21 = sshll.u32 %s1253_s2, 7 }
  0x5b   : > { %v205_v47 = vcombine.high %v1356_v46, %v1356_v46  ;;  %v208_v48 = vsel %vm207_vm0, %v1356_v46, -inf  ;;  %v222_v49 = vsel %vm207_vm0, %v1356_v46, 0.0  ;;  %v1046_v51 = vld [vmem:[#allocation6 + $0x1c0] ss:$8 sps:$4 sm:$0xff]   ;;  %v1047_v54 = vld [vmem:[#allocation6 + $0xb4] ss:$8 sps:$4 sm:$0xff]   ;;  %s750_s27 = scalar_lea.hbm %s1407_s3, %s915_s21 }
  0x5c   : > { %638 = vmatpush1.bf16.msra.mxu0 %v1003_v18  ;;  %v209_v52 = vrot.slane %v208_v48, 4  ;;  %v223_v53 = vrot.slane %v222_v49, 4  ;;  %v1049_v55 = vld [vmem:[#allocation6 + $0x1b4] ss:$8 sps:$4 sm:$0xff]   ;;  %v1051_v62 = vld [vmem:[#allocation6 + $0xb0] ss:$8 sps:$4 sm:$0xff]  }
  0x5d   : > { %679 = vmatpush1.bf16.msra.mxu1 %v1004_v19  ;;  %639 = vmatprep.subr.bf16.mxu0 %v1005_v20  ;;  %v215_v56 = vsel %vm207_vm0, %v205_v47, -inf  ;;  %v229_v57 = vsel %vm207_vm0, %v205_v47, 0.0  ;;  %v1052_v63 = vld [vmem:[#allocation6 + $0x1b0] ss:$8 sps:$4 sm:$0xff]   ;;  %v1055_v5 = vld [vmem:[#allocation6 + $0x1a4] ss:$8 sps:$4 sm:$0xff]  }
  0x5e   : > { %680 = vmatprep.subr.bf16.mxu1 %v1007_v21  ;;  %v216_v58 = vrot.slane %v215_v56, 4  ;;  %v230_v59 = vrot.slane %v229_v57, 4  ;;  %v210_v60 = vmax.f32 %v208_v48, %v209_v52  ;;  %v224_v61 = vadd.f32 %v223_v53, %v222_v49  ;;  %v1057_v10 = vld [vmem:[#allocation6 + $0xa0] ss:$8 sps:$4 sm:$0xff]   ;;  %v1059_v15 = vld [vmem:[#allocation6 + $0x94] ss:$8 sps:$4 sm:$0xff]  }
  0x5f   : > { %v1058_v11 = vld [vmem:[#allocation6 + $0x1a0] ss:$8 sps:$4 sm:$0xff]   ;;  %v1061_v16 = vld [vmem:[#allocation6 + $0x194] ss:$8 sps:$4 sm:$0xff]   ;;  %v1063_v21 = vld [vmem:[#allocation6 + $0x90] ss:$8 sps:$4 sm:$0xff]  }
  0x60   : > { %640 = vmatpush1.bf16.msra.mxu0 %v1009_v22  ;;  %v217_v0 = vmax.f32 %v215_v56, %v216_v58  ;;  %v231_v1 = vadd.f32 %v230_v59, %v229_v57  ;;  %v211_v2 = vrot.slane %v210_v60, 2  ;;  %v225_v3 = vrot.slane %v224_v61, 2  ;;  %v1064_v22 = vld [vmem:[#allocation6 + $0x190] ss:$8 sps:$4 sm:$0xff]   ;;  %s202_s13 = scalar_lea.vmem [#allocation8], %s840_s12  ;;  %s738_s28 = scalar_lea.sflag [#allocation5], %s1339_s11 }
  0x61   : > { %681 = vmatpush1.bf16.msra.mxu1 %v1010_v23  ;;  %641 = vmatprep.subr.bf16.mxu0 %v1011_v24  ;;  %v723_v56 = vlaneseq  ;;  %s752_s22 = sshll.u32 %s202_s13, 4  ;;  %p1423_p3 = scmp.ne.s32.totalorder %s1417_s7, 0  ;;  %s753_s22 = int_to_ptr.vmem [resolvable:$true] %s752_s22 }
  0x62   : > { %682 = vmatprep.subr.bf16.mxu1 %v1013_v25  ;;  %v218_v6 = vrot.slane %v217_v0, 2  ;;  %v232_v7 = vrot.slane %v231_v1, 2  ;;  %v226_v8 = vadd.f32 %v225_v3, %v224_v61  ;;  %v212_v9 = vmax.f32 %v210_v60, %v211_v2  ;;  %v1065_v25 = vld [vmem:[#allocation6 + $0x84] ss:$8 sps:$4 sm:$0xff]   ;;  %s1134_s29 = scalar_lea.vmem %s753_s22, 128  ;;  %s1208_s30 = smov [#allocation8]  }
  0x63   : > { %v724_v57 = vshrl.u32 %v723_v56, 7  ;;  %p1135_p8 = scmp.ne.s32.totalorder %s753_s22, %s1134_s29  ;;  %s1138_s2 = sshll.u32 %s1208_s30, 4  ;;  %s1139_s2 = int_to_ptr.vmem [resolvable:$false] %s1138_s2 }
  0x64   : > { %642 = vmatpush1.bf16.msra.mxu0 %v1015_v26  ;;  %v219_v12 = vmax.f32 %v217_v0, %v218_v6  ;;  %v233_v13 = vadd.f32 %v232_v7, %v231_v1  ;;  %v227_v14 = vrot.slane %v226_v8, 1  ;;  %v213_v19 = vrot.slane %v212_v9, 1  ;;  %v1067_v26 = vld [vmem:[#allocation6 + $0x184] ss:$8 sps:$4 sm:$0xff]   ;;  %s1140_s4 = scalar_lea.vmem %s1139_s2, 256  ;;  %p1141_p10 = scmp.lt.s32.totalorder %s753_s22, %s1139_s2 }
  0x65   : > { %683 = vmatpush1.bf16.msra.mxu1 %v1016_v27  ;;  %643 = vmatprep.subr.bf16.mxu0 %v1017_v28  ;;  %v725_v58 = vsub.s32 0, %v724_v57  ;;  %p1136_p11 = pnand %p1135_p8, %p1423_p3  ;;  %p1142_p2 = scmp.lt.s32.totalorder %s1140_s4, %s1134_s29 }
  0x66   : > { %684 = vmatprep.subr.bf16.mxu1 %v1019_v29  ;;  %v220_v17 = vrot.slane %v219_v12, 1  ;;  %v234_v18 = vrot.slane %v233_v13, 1  ;;  %v228_v20 = vadd.f32 %v227_v14, %v226_v8  ;;  %v214_v29 = vmax.f32 %v212_v9, %v213_v19 }
  0x67   : > { %p1137_p7 = pneg %p1136_p11  ;;  %p1143_p13 = por %p1142_p2, %p1141_p10 }
  0x68   : > { %644 = vmatpush1.bf16.msra.mxu0 %v1021_v30  ;;  %v221_v23 = vmax.f32 %v219_v12, %v220_v17  ;;  %v235_v24 = vadd.f32 %v234_v18, %v233_v13  ;;  %v237_v30 = vmul.f32 0.25, %v228_v20 }
  0x69   : > { %685 = vmatpush1.bf16.msra.mxu1 %v1022_v31  ;;  %645 = vmatprep.subr.bf16.mxu0 %v1023_v32  ;;  %v1069_v31 = vld [vmem:[#allocation6 + $0x80] ss:$8 sps:$4 sm:$0xff]   ;;  %p1144_p0 = pnand %p1143_p13, %p1137_p7 }
  0x6a   : > { %686 = vmatprep.subr.bf16.mxu1 %v1025_v33  ;;  %v240_v27 = vpack.c.bf16 %v221_v23, %v221_v23  ;;  %v238_v28 = vmul.f32 0.25, %v235_v24  ;;  %v1070_v32 = vld [vmem:[#allocation6 + $0x180] ss:$8 sps:$4 sm:$0xff]  }
  0x6c   : > { %646 = vmatpush2.bf16.msra.mxu0 %v1027_v34  ;;  %v242_v33 = vpack.c.bf16 %v238_v28, %v238_v28  ;;  %661 = vmatprep.mubr.bf16.mxu0 %v240_v27  ;;  %v239_v34 = vpack.c.bf16 %v214_v29, %v214_v29 }
  0x6d   : > { %687 = vmatpush2.bf16.msra.mxu1 %v1028_v35  ;;  %647 = vmatprep.subr.bf16.mxu0 %v1029_v36  ;;  %v241_v35 = vpack.c.bf16 %v237_v30, %v237_v30  ;;  %v308_v36 = vstv %s307_s19 }
  0x6e   : > { %688 = vmatprep.subr.bf16.mxu1 %v1031_v37  ;;  %702 = vmatprep.mubr.bf16.mxu1 %v242_v33 }
  0x70   : > { %648 = vmatpush2.bf16.msra.mxu0 %v1033_v38 }
  0x71   : > { %689 = vmatpush2.bf16.msra.mxu1 %v1034_v39  ;;  %649 = vmatprep.subr.bf16.mxu0 %v1035_v40 }
  0x72   : > { %690 = vmatprep.subr.bf16.mxu1 %v1037_v41 }
  0x74   : > { %650 = vmatpush2.bf16.msra.mxu0 %v1039_v42 }
  0x75   : > { %691 = vmatpush2.bf16.msra.mxu1 %v1040_v43  ;;  %651 = vmatprep.subr.bf16.mxu0 %v1041_v44 }
  0x76   : > { %692 = vmatprep.subr.bf16.mxu1 %v1043_v45 }
  0x78   : > { %652 = vmatpush2.bf16.msra.mxu0 %v1045_v50 }
  0x79   : > { %693 = vmatpush2.bf16.msra.mxu1 %v1046_v51  ;;  %653 = vmatprep.subr.bf16.mxu0 %v1047_v54 }
  0x7a   : > { %694 = vmatprep.subr.bf16.mxu1 %v1049_v55 }
  0x7c   : > { %654 = vmatpush2.bf16.msra.mxu0 %v1051_v62 }
  0x7d   : > { %695 = vmatpush2.bf16.msra.mxu1 %v1052_v63  ;;  %655 = vmatprep.subr.bf16.mxu0 %v1053_v4 }
  0x7e   : > { %696 = vmatprep.subr.bf16.mxu1 %v1055_v5 }
  0x80   : > { %656 = vmatpush2.bf16.msra.mxu0 %v1057_v10 }
  0x81   : > { %697 = vmatpush2.bf16.msra.mxu1 %v1058_v11  ;;  %657 = vmatprep.subr.bf16.mxu0 %v1059_v15 }
  0x82   : > { %698 = vmatprep.subr.bf16.mxu1 %v1061_v16 }
  0x84   : > { %658 = vmatpush2.bf16.msra.mxu0 %v1063_v21 }
  0x85   : > { %699 = vmatpush2.bf16.msra.mxu1 %v1064_v22  ;;  %659 = vmatprep.subr.bf16.mxu0 %v1065_v25 }
  0x86   : > { %700 = vmatprep.subr.bf16.mxu1 %v1067_v26 }
  0x88   : > { %660 = vmatpush2.bf16.msra.mxu0 %v1069_v31 }
  0x89   : > { %701 = vmatpush2.bf16.msra.mxu1 %v1070_v32 }
  0x8b   : > { %662 = vmatmul.mubr.bf16.vlgmr.msra.gmra.mxu0 %v239_v34 }
  0x8c   : > { %703 = vmatmul.mubr.bf16.vlgmr.msra.gmra.mxu1 %v241_v35 }
 0x14b   : > { %v663_v37 = vpop.f32.mrf.mxu0 }
 0x14c   : > { %v704_v38 = vpop.f32.mrf.mxu1  ;;  %v664_v39 = vadd.f32 %v663_v37, %v308_v36 }
 0x14d   : > { %v665_v40 = vpop.f32.mrf.mxu0 }
 0x14e   : > { %v706_v41 = vpop.f32.mrf.mxu1  ;;  %v705_v42 = vadd.f32 %v704_v38, %v664_v39  ;;  %v666_v43 = vadd.f32 %v665_v40, %v308_v36 }
 0x14f   : > { %v667_v44 = vpop.f32.mrf.mxu0 }
 0x150   : > { %v708_v45 = vpop.f32.mrf.mxu1  ;;  %v907_v47 = vmul.f32 -1.442695, %v705_v42  ;;  %v707_v48 = vadd.f32 %v706_v41, %v666_v43 }
 0x151   : > { %v668_v49 = vpop.f32.mrf.mxu0 }
 0x152   : > { %v709_v50 = vpop.f32.mrf.mxu1  ;;  %1072 = vpow2.f32 %v907_v47  ;;  %v908_v51 = vmul.f32 -1.442695, %v707_v48 }
 0x154   : > { %1074 = vpow2.f32 %v908_v51 }
 0x15f   : > { %v1073_v52 = vpop.eup %1072 }
 0x160   : > { %v717_v53 = vadd.f32 1.0, %v1073_v52 }
 0x161   : > { %v1075_v54 = vpop.eup %1074 }
 0x162   : > { %1076 = vrcp.f32 %v717_v53  ;;  %v718_v55 = vadd.f32 1.0, %v1075_v54 }
 0x164   : > { %1078 = vrcp.f32 %v718_v55 }
 0x16f   : > { %v1077_v59 = vpop.eup %1076 }
 0x170   : > { %v726_v61 = vrot.slane %v1077_v59, %v725_v58 }
 0x171   : > { %v1079_v60 = vpop.eup %1078 }
 0x172   : > { %v730_v62 = vrot.slane %v1079_v60, %v725_v58 }
 0x174   : > { %v733_v63 = vcombine.low %v726_v61, %v730_v62 }
 0x176   : > { %v735_v0 = vmul.f32 %v733_v63, %v1356_v46 }
 0x178   : > { %736 = vst [vmem:[%s202_s13] sm:$0xff] %v735_v0 }
 0x179   : > { %1147 = shalt.err (!%p1144_p0)
}
 0x17a   : > { %s1148_s5 = scalar_lea.hbm %s750_s27, 128  ;;  %s1152_s10 = scalar_lea.hbm %s1407_s3, 256 }
 0x17b   : > { %p1149_p5 = scmp.ne.s32.totalorder %s750_s27, %s1148_s5  ;;  %p1153_p1 = scmp.lt.s32.totalorder %s750_s27, %s1407_s3 }
 0x17c   : > { %p1154_p4 = scmp.lt.s32.totalorder %s1152_s10, %s1148_s5 }
 0x17d   : > { %p1150_p9 = pnand %p1149_p5, %p1423_p3 }
 0x17e   : > { %p1155_p6 = por %p1154_p4, %p1153_p1 }
 0x17f   : > { %p1151_p12 = pneg %p1150_p9 }
 0x181   : > { %p1156_p8 = pnand %p1155_p6, %p1151_p12 }
 0x183   : > { %1159 = shalt.err (!%p1156_p8)
}
 0x184   : > { %922 = dma.vmem_to_hbm [thread:$0]  (%p1423_p3), %s753_s22, 128, %s750_s27, %s738_s28  }
 0x185 PF: > { %s764_s18 = sand.u32 1, %s1190_s14   ;;  %p1424_p11 = scmp.ne.s32.totalorder %s1413_s20, 0 }
 0x186   : > { %p1425_p7 = scmp.ge.s32.totalorder %s1202_s17, 2  ;;  %s765_s26 = scalar_lea.sflag [#allocation5], %s764_s18 }
 0x188   : > { %p933_p10 = pnand %p1425_p7, %p1424_p11 }
 0x18a   : > { %p934_p2 = pneg %p933_p10 }
 0x18c   : > { %1185 = dma.done.wait (%p934_p2), %s765_s26, 128  }
 0x18d   : > { %1187 = vsyncadd (%p934_p2), %s765_s26, 4294967168  ;;  %p18_p13 = scmp.ge.s32.totalorder %s1286_s25, 4   ;;  %s1426_s14 = smov %s1194_s15 }
 0x18e   : > { %s1427_s15 = smov %s1198_s16  ;;  %s1428_s16 = smov %s1303_s6 }
 0x18f   : > { %s1429_s17 = smov %s1286_s25  ;;  %20 = sbr.rel (!%p18_p13) target bundleno = 8 (0x8), region = 81 }
 0x194   :  { %770 = vsyncpa [#allocation4], 1 }
 0x195   :  { %772 = vsyncpa [#allocation4 + $0x1], 1 }
 0x196   :  { %773 = vsyncpa [#allocation7], 1 }
 0x197   :  { %774 = vsyncpa [#allocation5], 1 }
 0x198   :  { %776 = vsyncpa [#allocation5 + $0x1], 1 }

</bundles_post_ra>
